<compile_context>
chip_gen: v7x
topology: tpu7x:2x2x1
jax: 0.10.0
libtpu: 0.0.40
codegen_flags: <defaults>
</compile_context>

<pallas_src>
import functools

import jax
import jax.numpy as jnp
from jax.experimental import pallas as pl
from jax.experimental.pallas import tpu as pltpu

H1 = 400          # logical hidden sizes (PyTorch spec)
H2 = 300
H1P = 512         # lane-padded hidden sizes used inside the kernel
H2P = 384
MAX_TB = 1024     # batch tile (sized against v7x 64 MiB VMEM)


def critic_kernel(sa_ref, w1_ref, b1_ref, w2s_ref, w2a_ref, b2_ref,
                  w3_ref, b3_ref, out_ref, *, state_dim):
    sa = sa_ref[...]                       # (TB, state_dim + action_dim)
    state = sa[:, :state_dim]              # (TB, state_dim)
    action = sa[:, state_dim:]             # (TB, action_dim)

    # Layer 1: relu(state @ W1 + b1)   -> (TB, H1P), padded lanes are exactly 0
    q1 = jnp.dot(state, w1_ref[...],
                 preferred_element_type=jnp.float32) + b1_ref[...]
    q1 = jnp.maximum(q1, 0.0)

    # Layer 2: relu(cat([q1, action]) @ W2 + b2) via exact split matmul
    q2 = (jnp.dot(q1, w2s_ref[...], preferred_element_type=jnp.float32)
          + jnp.dot(action, w2a_ref[...], preferred_element_type=jnp.float32)
          + b2_ref[...])
    q2 = jnp.maximum(q2, 0.0)              # (TB, H2P), padded lanes are 0

    # Layer 3 (N=1): VPU multiply + cross-lane reduce instead of a 1-wide matmul.
    out_ref[...] = (jnp.sum(q2 * w3_ref[...], axis=-1, keepdims=True)
                    + b3_ref[...])


def critic_forward(state, action, params):
    """state: (B, state_dim) f32, action: (B, action_dim) f32 -> (B, 1) f32."""
    B, state_dim = state.shape
    action_dim = action.shape[1]
    w1, b1, w2s, w2a, b2, w3_row, b3 = params
    d_in = state_dim + action_dim

    # Pack state||action into one activation slab (single DMA stream per step).
    sa = jnp.concatenate([state, action], axis=1)

    # Batch tiling: one block for small B, MAX_TB-row tiles (padded) otherwise.
    if B <= MAX_TB:
        tb, bp = B, B
    else:
        tb = MAX_TB
        bp = ((B + tb - 1) // tb) * tb
        if bp != B:
            sa = jnp.pad(sa, ((0, bp - B), (0, 0)))
    n_blocks = bp // tb

    kernel = functools.partial(critic_kernel, state_dim=state_dim)

    const = lambda i: (0, 0)   # weights/biases: resident, DMA'd once
    out = pl.pallas_call(
        kernel,
        out_shape=jax.ShapeDtypeStruct((bp, 1), jnp.float32),
        grid_spec=pltpu.PrefetchScalarGridSpec(
            num_scalar_prefetch=0,
            grid=(n_blocks,),
            in_specs=[
                pl.BlockSpec((tb, d_in), lambda i: (i, 0)),        # streamed acts
                pl.BlockSpec((state_dim, H1P), const),             # W1
                pl.BlockSpec((1, H1P), const),                     # b1
                pl.BlockSpec((H1P, H2P), const),                   # W2 (state part)
                pl.BlockSpec((action_dim, H2P), const),            # W2 (action part)
                pl.BlockSpec((1, H2P), const),                     # b2
                pl.BlockSpec((1, H2P), const),                     # W3 as a row
                pl.BlockSpec((1, 1), const),                       # b3
            ],
            out_specs=pl.BlockSpec((tb, 1), lambda i: (i, 0)),
        ),
        compiler_params=pltpu.CompilerParams(
            dimension_semantics=("parallel",),   # megacore on v7x; no-op on v5e/v6e
        ),
    )(sa, w1, b1, w2s, w2a, b2, w3_row, b3)

    return out[:B]


def init_params(key, state_dim, action_dim):
    """PyTorch-Linear-like init (uniform +-1/sqrt(fan_in)), logical shapes."""
    ks = jax.random.split(key, 6)

    def lin(kw, kb, fan_in, fan_out):
        bound = 1.0 / float(fan_in) ** 0.5
        w = jax.random.uniform(kw, (fan_in, fan_out), jnp.float32, -bound, bound)
        b = jax.random.uniform(kb, (fan_out,), jnp.float32, -bound, bound)
        return w, b

    w1, b1 = lin(ks[0], ks[1], state_dim, H1)
    w2, b2 = lin(ks[2], ks[3], H1 + action_dim, H2)
    w3, b3 = lin(ks[4], ks[5], H2, 1)
    return (w1, b1, w2, b2, w3, b3)


def pad_params(raw, state_dim, action_dim):
    """Zero-pad hidden dims to lane multiples and split W2; math is unchanged."""
    w1, b1, w2, b2, w3, b3 = raw
    w2s, w2a = w2[:H1], w2[H1:]

    w1p = jnp.zeros((state_dim, H1P), jnp.float32).at[:, :H1].set(w1)
    b1p = jnp.zeros((1, H1P), jnp.float32).at[:, :H1].set(b1)
    w2sp = jnp.zeros((H1P, H2P), jnp.float32).at[:H1, :H2].set(w2s)
    w2ap = jnp.zeros((action_dim, H2P), jnp.float32).at[:, :H2].set(w2a)
    b2p = jnp.zeros((1, H2P), jnp.float32).at[:, :H2].set(b2)
    w3p = jnp.zeros((1, H2P), jnp.float32).at[:, :H2].set(w3[:, 0])
    b3p = b3.reshape(1, 1)
    return (w1p, b1p, w2sp, w2ap, b2p, w3p, b3p)


def critic_ref(state, action, raw):
    """Pure-JAX reference, identical to the PyTorch forward (unpadded params)."""
    w1, b1, w2, b2, w3, b3 = raw
    q = jax.nn.relu(state @ w1 + b1)
    q = jax.nn.relu(jnp.concatenate([q, action], axis=1) @ w2 + b2)
    return q @ w3 + b3


if __name__ == "__main__":
    key = jax.random.PRNGKey(0)
    k_params, k_state, k_action = jax.random.split(key, 3)

    batch = 2
    state_dim = 16
    action_dim = 4

    raw = init_params(k_params, state_dim, action_dim)
    params = pad_params(raw, state_dim, action_dim)
    state = jax.random.normal(k_state, (batch, state_dim), jnp.float32)
    action = jax.random.normal(k_action, (batch, action_dim), jnp.float32)

    out = jax.block_until_ready(critic_forward(state, action, params))
    ref = critic_ref(state, action, raw)

    assert out.shape == (batch, 1)
    assert jnp.allclose(out, ref, atol=1e-4, rtol=1e-4)

    print("KERNEL_OK")
</pallas_src>

<mosaic_0001>
module attributes {stable_mosaic.version = 11 : i64} {
  func.func @critic_kernel(%arg0: i32, %arg1: memref<2x20xf32, #tpu.memory_space<vmem>>, %arg2: memref<16x512xf32, #tpu.memory_space<vmem>>, %arg3: memref<1x512xf32, #tpu.memory_space<vmem>>, %arg4: memref<512x384xf32, #tpu.memory_space<vmem>>, %arg5: memref<4x384xf32, #tpu.memory_space<vmem>>, %arg6: memref<1x384xf32, #tpu.memory_space<vmem>>, %arg7: memref<1x384xf32, #tpu.memory_space<vmem>>, %arg8: memref<1x1xf32, #tpu.memory_space<vmem>>, %arg9: memref<2x1xf32, #tpu.memory_space<vmem>>) attributes {dimension_semantics = [#tpu.dimension_semantics<parallel>], iteration_bounds = array<i64: 1>, scalar_prefetch = 0 : i64, scratch_operands = 0 : i64, tpu.core_type = #tpu.core_type<tc>, window_params = [{transform_indices = @transform_0, window_bounds = array<i64: 2, 20>}, {pipeline_mode = #tpu.pipeline_mode<synchronous>, transform_indices = @transform_1, window_bounds = array<i64: 16, 512>}, {pipeline_mode = #tpu.pipeline_mode<synchronous>, transform_indices = @transform_2, window_bounds = array<i64: 1, 512>}, {pipeline_mode = #tpu.pipeline_mode<synchronous>, transform_indices = @transform_3, window_bounds = array<i64: 512, 384>}, {pipeline_mode = #tpu.pipeline_mode<synchronous>, transform_indices = @transform_4, window_bounds = array<i64: 4, 384>}, {pipeline_mode = #tpu.pipeline_mode<synchronous>, transform_indices = @transform_5, window_bounds = array<i64: 1, 384>}, {pipeline_mode = #tpu.pipeline_mode<synchronous>, transform_indices = @transform_6, window_bounds = array<i64: 1, 384>}, {pipeline_mode = #tpu.pipeline_mode<synchronous>, transform_indices = @transform_7, window_bounds = array<i64: 1, 1>}, {transform_indices = @transform_8, window_bounds = array<i64: 2, 1>}]} {
    %c0 = arith.constant 0 : index
    %c0_0 = arith.constant 0 : index
    %0 = vector.load %arg1[%c0, %c0_0] : memref<2x20xf32, #tpu.memory_space<vmem>>, vector<2x20xf32>
    %1 = vector.extract_strided_slice %0 {offsets = [0, 0], sizes = [2, 16], strides = [1, 1]} : vector<2x20xf32> to vector<2x16xf32>
    %2 = vector.extract_strided_slice %0 {offsets = [0, 16], sizes = [2, 4], strides = [1, 1]} : vector<2x20xf32> to vector<2x4xf32>
    %c0_1 = arith.constant 0 : index
    %c0_2 = arith.constant 0 : index
    %3 = vector.load %arg2[%c0_1, %c0_2] : memref<16x512xf32, #tpu.memory_space<vmem>>, vector<16x512xf32>
    %cst = arith.constant dense<0.000000e+00> : vector<2x512xf32>
    %4 = tpu.matmul %1, %3, %cst {dimension_numbers = #tpu.dot_dimension_numbers<[1], [0], [0], [1], [0, 0, 1, 1], [], []>} : vector<2x16xf32>, vector<16x512xf32>, vector<2x512xf32> -> vector<2x512xf32>
    %c0_3 = arith.constant 0 : index
    %c0_4 = arith.constant 0 : index
    %5 = vector.load %arg3[%c0_3, %c0_4] : memref<1x512xf32, #tpu.memory_space<vmem>>, vector<1x512xf32>
    %6 = vector.broadcast %5 : vector<1x512xf32> to vector<2x512xf32>
    %7 = arith.addf %4, %6 : vector<2x512xf32>
    %cst_5 = arith.constant 0.000000e+00 : f32
    %8 = vector.broadcast %cst_5 : f32 to vector<2x512xf32>
    %9 = arith.maximumf %7, %8 : vector<2x512xf32>
    %c0_6 = arith.constant 0 : index
    %c0_7 = arith.constant 0 : index
    %10 = vector.load %arg4[%c0_6, %c0_7] : memref<512x384xf32, #tpu.memory_space<vmem>>, vector<512x384xf32>
    %cst_8 = arith.constant dense<0.000000e+00> : vector<2x384xf32>
    %11 = tpu.matmul %9, %10, %cst_8 {dimension_numbers = #tpu.dot_dimension_numbers<[1], [0], [0], [1], [0, 0, 1, 1], [], []>} : vector<2x512xf32>, vector<512x384xf32>, vector<2x384xf32> -> vector<2x384xf32>
    %c0_9 = arith.constant 0 : index
    %c0_10 = arith.constant 0 : index
    %12 = vector.load %arg5[%c0_9, %c0_10] : memref<4x384xf32, #tpu.memory_space<vmem>>, vector<4x384xf32>
    %cst_11 = arith.constant dense<0.000000e+00> : vector<2x384xf32>
    %13 = tpu.matmul %2, %12, %cst_11 {dimension_numbers = #tpu.dot_dimension_numbers<[1], [0], [0], [1], [0, 0, 1, 1], [], []>} : vector<2x4xf32>, vector<4x384xf32>, vector<2x384xf32> -> vector<2x384xf32>
    %14 = arith.addf %11, %13 : vector<2x384xf32>
    %c0_12 = arith.constant 0 : index
    %c0_13 = arith.constant 0 : index
    %15 = vector.load %arg6[%c0_12, %c0_13] : memref<1x384xf32, #tpu.memory_space<vmem>>, vector<1x384xf32>
    %16 = vector.broadcast %15 : vector<1x384xf32> to vector<2x384xf32>
    %17 = arith.addf %14, %16 : vector<2x384xf32>
    %cst_14 = arith.constant 0.000000e+00 : f32
    %18 = vector.broadcast %cst_14 : f32 to vector<2x384xf32>
    %19 = arith.maximumf %17, %18 : vector<2x384xf32>
    %c0_15 = arith.constant 0 : index
    %c0_16 = arith.constant 0 : index
    %20 = vector.load %arg7[%c0_15, %c0_16] : memref<1x384xf32, #tpu.memory_space<vmem>>, vector<1x384xf32>
    %21 = vector.broadcast %20 : vector<1x384xf32> to vector<2x384xf32>
    %22 = arith.mulf %19, %21 : vector<2x384xf32>
    %cst_17 = arith.constant dense<0.000000e+00> : vector<2xf32>
    %23 = vector.multi_reduction <add>, %22, %cst_17 [1] : vector<2x384xf32> to vector<2xf32>
    %24 = vector.shape_cast %23 : vector<2xf32> to vector<2x1xf32>
    %c0_18 = arith.constant 0 : index
    %c0_19 = arith.constant 0 : index
    %25 = vector.load %arg8[%c0_18, %c0_19] : memref<1x1xf32, #tpu.memory_space<vmem>>, vector<1x1xf32>
    %26 = vector.broadcast %25 : vector<1x1xf32> to vector<2x1xf32>
    %27 = arith.addf %24, %26 : vector<2x1xf32>
    %c0_20 = arith.constant 0 : index
    %c0_21 = arith.constant 0 : index
    %28 = vector.load %arg9[%c0_20, %c0_21] : memref<2x1xf32, #tpu.memory_space<vmem>>, vector<2x1xf32>
    tpu.vector_store %arg9[%c0_20, %c0_21], %27 {strides = array<i32>} : memref<2x1xf32, #tpu.memory_space<vmem>>, vector<2x1xf32>,
    return
  }
  func.func @transform_0(%arg0: i32) -> (i32, i32) {
    %c0_i32 = arith.constant 0 : i32
    %c0_i32_0 = arith.constant 0 : i32
    return %arg0, %c0_i32 : i32, i32
  }
  func.func @transform_1(%arg0: i32) -> (i32, i32) {
    %c0_i32 = arith.constant 0 : i32
    %c0_i32_0 = arith.constant 0 : i32
    %c0_i32_1 = arith.constant 0 : i32
    return %c0_i32, %c0_i32_0 : i32, i32
  }
  func.func @transform_2(%arg0: i32) -> (i32, i32) {
    %c0_i32 = arith.constant 0 : i32
    %c0_i32_0 = arith.constant 0 : i32
    %c0_i32_1 = arith.constant 0 : i32
    return %c0_i32, %c0_i32_0 : i32, i32
  }
  func.func @transform_3(%arg0: i32) -> (i32, i32) {
    %c0_i32 = arith.constant 0 : i32
    %c0_i32_0 = arith.constant 0 : i32
    %c0_i32_1 = arith.constant 0 : i32
    return %c0_i32, %c0_i32_0 : i32, i32
  }
  func.func @transform_4(%arg0: i32) -> (i32, i32) {
    %c0_i32 = arith.constant 0 : i32
    %c0_i32_0 = arith.constant 0 : i32
    %c0_i32_1 = arith.constant 0 : i32
    return %c0_i32, %c0_i32_0 : i32, i32
  }
  func.func @transform_5(%arg0: i32) -> (i32, i32) {
    %c0_i32 = arith.constant 0 : i32
    %c0_i32_0 = arith.constant 0 : i32
    %c0_i32_1 = arith.constant 0 : i32
    return %c0_i32, %c0_i32_0 : i32, i32
  }
  func.func @transform_6(%arg0: i32) -> (i32, i32) {
    %c0_i32 = arith.constant 0 : i32
    %c0_i32_0 = arith.constant 0 : i32
    %c0_i32_1 = arith.constant 0 : i32
    return %c0_i32, %c0_i32_0 : i32, i32
  }
  func.func @transform_7(%arg0: i32) -> (i32, i32) {
    %c0_i32 = arith.constant 0 : i32
    %c0_i32_0 = arith.constant 0 : i32
    %c0_i32_1 = arith.constant 0 : i32
    return %c0_i32, %c0_i32_0 : i32, i32
  }
  func.func @transform_8(%arg0: i32) -> (i32, i32) {
    %c0_i32 = arith.constant 0 : i32
    %c0_i32_0 = arith.constant 0 : i32
    return %arg0, %c0_i32 : i32, i32
  }
}

</mosaic_0001>

<bundles_post_ra>
// kernel: tpu_custom_call.1
= control target key start
LH: loop header
LB: loop body
LE: loop exit
PB: predicated region body
PF: predicated region fallthrough
CT: control target
= control target key end

     0   :  { %s1477_s0 = inlined_call_operand.hbm [shape: f32[2,20], index: 0, kind: input, shape index: {}]   ;;  %s1478_s1 = inlined_call_operand.hbm [shape: f32[16,512], index: 1, kind: input, shape index: {}]   ;;  %s1479_s2 = inlined_call_operand.vmem [shape: f32[1,512], index: 2, kind: input, shape index: {}]   ;;  %s1480_s3 = inlined_call_operand.hbm [shape: f32[512,384], index: 3, kind: input, shape index: {}]   ;;  %s1481_s4 = inlined_call_operand.vmem [shape: f32[4,384], index: 4, kind: input, shape index: {}]   ;;  %s1482_s5 = inlined_call_operand.vmem [shape: f32[1,384], index: 5, kind: input, shape index: {}]   ;;  %s1483_s6 = inlined_call_operand.vmem [shape: f32[1,384], index: 6, kind: input, shape index: {}]   ;;  %s1484_s7 = inlined_call_operand.<no memory space> [shape: f32[1,1], index: 7, kind: input, shape index: {}]   ;;  %s1485_s8 = inlined_call_operand.vmem [shape: f32[2,1], index: 8, kind: output, shape index: {}]  }
   0x1   :  { %v13_v0 = vstv %s1484_s7 }
   0x2   :  { %14 = vst [vmem:[#allocation2] sm:$0x1] %v13_v0 }
   0x3   :  { %15 = vsyncpa [#allocation4], 0 }
   0x4   :  { %16 = vsyncpa [#allocation6], 0  ;;  %s1320_s29 = smov [#allocation5]   ;;  %s1250_s11 = scalar_lea.hbm %s1478_s1, 1024 }
   0x5   :  { %s32_s30 = sshll.u32 %s1320_s29, 4  ;;  %p1251_p0 = scmp.ne.s32.totalorder %s1478_s1, %s1250_s11  ;;  %s33_s30 = int_to_ptr.vmem [resolvable:$true] %s32_s30 }
   0x6   :  { %p1254_p1 = scmp.lt.u32.totalorder %s1250_s11, %s1478_s1 }
   0x8   :  { %p1256_p2 = pnand %p1254_p1, %p1251_p0 }
   0xa   :  { %1259 = shalt.err (!%p1256_p2)
}
   0xb   :  { %s1260_s7 = scalar_lea.vmem %s33_s30, 1024  ;;  %p1265_p4 = scmp.lt.s32.totalorder %s33_s30, %s33_s30 }
   0xc   :  { %p1261_p3 = scmp.ne.s32.totalorder %s33_s30, %s1260_s7  ;;  %p1266_p5 = scmp.lt.s32.totalorder %s1260_s7, %s1260_s7 }
   0xe   :  { %p1267_p6 = por %p1266_p5, %p1265_p4 }
  0x10   :  { %p1268_p7 = pnand %p1267_p6, %p1261_p3 }
  0x12   :  { %1271 = shalt.err (!%p1268_p7)
}
  0x13   :  { %s1321_s16 = smov 512   ;;  %s1322_s17 = smov 32  }
  0x14   :  { %38 = dma.hbm_to_vmem [thread:$0]  %s1478_s1, 1024, %s33_s30, [#allocation6], %s1321_s16, %s1321_s16, %s1322_s17  }
  0x15   :  { %s1323_s20 = smov [#allocation3]   ;;  %s1324_s22 = smov [#allocation7]  }
  0x16   :  { %s23_s21 = sshll.u32 %s1323_s20, 4  ;;  %s46_s23 = sshll.u32 %s1324_s22, 4  ;;  %s24_s21 = int_to_ptr.vmem [resolvable:$true] %s23_s21  ;;  %s47_s23 = int_to_ptr.vmem [resolvable:$true] %s46_s23 }
  0x17   :  { %s1272_s26 = scalar_lea.hbm %s1477_s0, 32 }
  0x18   :  { %p1273_p8 = scmp.ne.s32.totalorder %s1477_s0, %s1272_s26  ;;  %p1276_p9 = scmp.lt.u32.totalorder %s1272_s26, %s1477_s0 }
  0x1a   :  { %p1278_p10 = pnand %p1276_p9, %p1273_p8 }
  0x1c   :  { %1281 = shalt.err (!%p1278_p10)
}
  0x1d   :  { %s1282_s1 = scalar_lea.vmem %s24_s21, 32  ;;  %p1287_p12 = scmp.lt.s32.totalorder %s24_s21, %s24_s21 }
  0x1e   :  { %p1283_p11 = scmp.ne.s32.totalorder %s24_s21, %s1282_s1  ;;  %p1288_p13 = scmp.lt.s32.totalorder %s1282_s1, %s1282_s1 }
  0x20   :  { %p1289_p0 = por %p1288_p13, %p1287_p12 }
  0x22   :  { %p1290_p1 = pnand %p1289_p0, %p1283_p11 }
  0x24   :  { %1293 = shalt.err (!%p1290_p1)
}
  0x25   :  { %26 = dma.hbm_to_vmem [thread:$0]  %s1477_s0, 32, %s24_s21, [#allocation4]  }
  0x26   :  { %s1294_s13 = scalar_lea.hbm %s1480_s3, 24576 }
  0x27   :  { %p1295_p2 = scmp.ne.s32.totalorder %s1480_s3, %s1294_s13  ;;  %p1298_p3 = scmp.lt.u32.totalorder %s1294_s13, %s1480_s3 }
  0x29   :  { %p1300_p4 = pnand %p1298_p3, %p1295_p2 }
  0x2b   :  { %1303 = shalt.err (!%p1300_p4)
}
  0x2c   :  { %s1304_s17 = scalar_lea.vmem %s47_s23, 24576  ;;  %p1309_p6 = scmp.lt.s32.totalorder %s47_s23, %s47_s23 }
  0x2d   :  { %p1305_p5 = scmp.ne.s32.totalorder %s47_s23, %s1304_s17  ;;  %p1310_p7 = scmp.lt.s32.totalorder %s1304_s17, %s1304_s17 }
  0x2f   :  { %p1311_p8 = por %p1310_p7, %p1309_p6 }
  0x31   :  { %p1312_p9 = pnand %p1311_p8, %p1305_p5 }
  0x33   :  { %1315 = shalt.err (!%p1312_p9)
}
  0x34   :  { %s1325_s0 = smov 384   ;;  %s1326_s18 = smov 24  }
  0x35   :  { %52 = dma.hbm_to_vmem [thread:$0]  %s1480_s3, 24576, %s47_s23, [#allocation6], %s1325_s0, %s1325_s0, %s1326_s18  }
  0x36   :  { %1316 = dma.done.wait [#allocation4], 32  }
  0x37   :  { %1317 = vsyncadd [#allocation4], 4294967264 }
  0x38   :  { %1318 = dma.done.wait [#allocation6], 25600  }
  0x39   :  { %1319 = vsyncadd [#allocation6], 4294941696  ;;  %v1327_v1 = vmov 0.0   ;;  %v72_v2 = vld [vmem:[#allocation5 + $0x8] sm:$0xff]  ;;  %v71_v4 = vld [vmem:[#allocation5] sm:$0xff]  ;;  %s1328_s21 = smov 112  }
  0x3a   :  { %169 = vmatprep.mubr.f32.mxu1 %v1327_v1  ;;  %v76_v3 = vld [vmem:[#allocation5 + $0x28] sm:$0xff]  ;;  %v75_v6 = vld [vmem:[#allocation5 + $0x20] sm:$0xff]  ;;  %v70_v7 = vld [vmem:[#allocation3] sm:$0x3]  ;;  %vm101_vm0 = vcmask 130048   ;;  %vm453_vm1 = vcmask 1043456  }
  0x3b   :  { %v1035_v5 = vpack.c.bf16 %v76_v3, %v72_v2  ;;  %v74_v8 = vld [vmem:[#allocation5 + $0x18] sm:$0xff]  ;;  %v1037_v9 = vpack.c.bf16 %v75_v6, %v71_v4  ;;  %v73_v11 = vld [vmem:[#allocation5 + $0x10] sm:$0xff]  ;;  %445 = vrot.lane.b32.xlu0 %v70_v7, %s1328_s21  ;;  %v252_v14 = vld [vmem:[#allocation7 + $0x8] sm:$0xff]  ;;  %vm450_vm2 = vcmask 31744   ;;  %vm1329_vm3 = vmmov 0  }
  0x3c   :  { %v78_v10 = vld [vmem:[#allocation5 + $0x38] sm:$0xff]  ;;  %v77_v12 = vld [vmem:[#allocation5 + $0x30] sm:$0xff]  ;;  %v255_v15 = vld [vmem:[#allocation7 + $0x20] sm:$0xff]  ;;  %vm926_vm4 = vcmask 1041408   ;;  %vm942_vm5 = vcmask 1024  }
  0x3d   :  { %1036 = vmatprep.subr.bf16.mxu1 %v1035_v5  ;;  %v1039_v13 = vpack.c.bf16 %v78_v10, %v74_v8  ;;  %v251_v16 = vld [vmem:[#allocation7] sm:$0xff]  ;;  %v1041_v17 = vpack.c.bf16 %v77_v12, %v73_v11  ;;  %v1043_v18 = vpack.c.bf16 %v255_v15, %v252_v14  ;;  %v254_v19 = vld [vmem:[#allocation7 + $0x18] sm:$0xff]  ;;  %v261_v21 = vld [vmem:[#allocation7 + $0x50] sm:$0xff] }
  0x3e   :  { %1038 = vmatpush1.bf16.msra.mxu1 %v1037_v9  ;;  %v258_v20 = vld [vmem:[#allocation7 + $0x38] sm:$0xff]  ;;  %v1045_v22 = vpack.c.bf16 %v254_v19, %v251_v16  ;;  %v257_v24 = vld [vmem:[#allocation7 + $0x30] sm:$0xff]  ;;  %v260_v25 = vld [vmem:[#allocation7 + $0x48] sm:$0xff] }
  0x3f   :  { %1040 = vmatprep.subr.bf16.mxu1 %v1039_v13  ;;  %v1047_v23 = vpack.c.bf16 %v261_v21, %v258_v20  ;;  %v264_v26 = vld [vmem:[#allocation7 + $0x68] sm:$0xff]  ;;  %1044 = vmatprep.subr.bf16.mxu0 %v1043_v18  ;;  %v267_v27 = vld [vmem:[#allocation7 + $0x80] sm:$0xff]  ;;  %v1049_v28 = vpack.c.bf16 %v260_v25, %v257_v24  ;;  %v266_v31 = vld [vmem:[#allocation7 + $0x78] sm:$0xff] }
  0x40   :  { %1046 = vmatpush1.bf16.msra.mxu0 %v1045_v22  ;;  %v1051_v29 = vpack.c.bf16 %v267_v27, %v264_v26  ;;  %v263_v30 = vld [vmem:[#allocation7 + $0x60] sm:$0xff]  ;;  %v270_v32 = vld [vmem:[#allocation7 + $0x98] sm:$0xff]  ;;  %v273_v33 = vld [vmem:[#allocation7 + $0xb0] sm:$0xff] }
  0x41   :  { %950 = vmatmul.mubr.msk.f32.vlgmr.msra.gmra.mrb[0].mxu1 %vm101_vm0, %v70_v7  ;;  %1048 = vmatprep.subr.bf16.mxu0 %v1047_v23  ;;  %v1053_v34 = vpack.c.bf16 %v266_v31, %v263_v30  ;;  %v1055_v35 = vpack.c.bf16 %v273_v33, %v270_v32  ;;  %v269_v36 = vld [vmem:[#allocation7 + $0x90] sm:$0xff]  ;;  %v272_v37 = vld [vmem:[#allocation7 + $0xa8] sm:$0xff]  ;;  %v443_v38 = vld [vmem:[%s1481_s4] sm:$0xff] }
  0x42   :  { %1042 = vmatpush1.bf16.msra.mxu1 %v1041_v17  ;;  %240 = vmatprep.mubr.f32.mxu1 %v1327_v1  ;;  %v276_v39 = vld [vmem:[#allocation7 + $0xc8] sm:$0xff]  ;;  %v279_v40 = vld [vmem:[#allocation7 + $0xe0] sm:$0xff]  ;;  %v449_v41 = vcombine.high %v443_v38, %v443_v38  ;;  %v1057_v42 = vpack.c.bf16 %v272_v37, %v269_v36  ;;  %v278_v45 = vld [vmem:[#allocation7 + $0xd8] sm:$0xff] }
  0x43   :  { %v1059_v43 = vpack.c.bf16 %v279_v40, %v276_v39  ;;  %v275_v44 = vld [vmem:[#allocation7 + $0xc0] sm:$0xff]  ;;  %v282_v46 = vld [vmem:[#allocation7 + $0xf8] sm:$0xff]  ;;  %v285_v47 = vld [vmem:[#allocation7 + $0x110] sm:$0xff] }
  0x44   :  { %1050 = vmatpush1.bf16.msra.mxu0 %v1049_v28  ;;  %952 = vmatprep.subr.msk.mxu1 %vm453_vm1, %v449_v41  ;;  %v1061_v48 = vpack.c.bf16 %v278_v45, %v275_v44  ;;  %v1063_v49 = vpack.c.bf16 %v285_v47, %v282_v46  ;;  %v281_v50 = vld [vmem:[#allocation7 + $0xf0] sm:$0xff]  ;;  %v284_v51 = vld [vmem:[#allocation7 + $0x108] sm:$0xff]  ;;  %v291_v53 = vld [vmem:[#allocation7 + $0x140] sm:$0xff] }
  0x45   :  { %951 = vmatmul.mubr.msk.f32.vlgmr.msra.gmra.mrb[2].mxu1 %vm101_vm0, %v70_v7  ;;  %1052 = vmatprep.subr.bf16.mxu0 %v1051_v29  ;;  %v288_v52 = vld [vmem:[#allocation7 + $0x128] sm:$0xff]  ;;  %v1065_v54 = vpack.c.bf16 %v284_v51, %v281_v50  ;;  %v287_v56 = vld [vmem:[#allocation7 + $0x120] sm:$0xff]  ;;  %v290_v57 = vld [vmem:[#allocation7 + $0x138] sm:$0xff] }
  0x46   :  { %524 = vmatprep.mubr.f32.mxu1 %v1327_v1  ;;  %953 = vmatpush1.msk.msra.mxu1 %vm453_vm1, %v443_v38  ;;  %v1067_v55 = vpack.c.bf16 %v291_v53, %v288_v52  ;;  %v294_v58 = vld [vmem:[#allocation7 + $0x158] sm:$0xff]  ;;  %v297_v59 = vld [vmem:[#allocation7 + $0x170] sm:$0xff]  ;;  %v1069_v60 = vpack.c.bf16 %v290_v57, %v287_v56  ;;  %v296_v63 = vld [vmem:[#allocation7 + $0x168] sm:$0xff] }
  0x47   :  { %1030 = vmatprep.subr.mxu1 %v1327_v1  ;;  %v1071_v61 = vpack.c.bf16 %v297_v59, %v294_v58  ;;  %v293_v62 = vld [vmem:[#allocation7 + $0x150] sm:$0xff]  ;;  %v300_v0 = vld [vmem:[#allocation7 + $0x188] sm:$0xff]  ;;  %v303_v2 = vld [vmem:[#allocation7 + $0x1a0] sm:$0xff] }
  0x48   :  { %1054 = vmatpush1.bf16.msra.mxu0 %v1053_v34  ;;  %v1073_v3 = vpack.c.bf16 %v296_v63, %v293_v62  ;;  %v1075_v4 = vpack.c.bf16 %v303_v2, %v300_v0  ;;  %v299_v5 = vld [vmem:[#allocation7 + $0x180] sm:$0xff]  ;;  %v302_v6 = vld [vmem:[#allocation7 + $0x198] sm:$0xff]  ;;  %v309_v8 = vld [vmem:[#allocation7 + $0x1d0] sm:$0xff] }
  0x49   :  { %1056 = vmatprep.subr.bf16.mxu0 %v1055_v35  ;;  %v306_v7 = vld [vmem:[#allocation7 + $0x1b8] sm:$0xff]  ;;  %v1077_v9 = vpack.c.bf16 %v302_v6, %v299_v5  ;;  %v305_v11 = vld [vmem:[#allocation7 + $0x1b0] sm:$0xff]  ;;  %v308_v12 = vld [vmem:[#allocation7 + $0x1c8] sm:$0xff] }
  0x4a   :  { %v1079_v10 = vpack.c.bf16 %v309_v8, %v306_v7  ;;  %v312_v13 = vld [vmem:[#allocation7 + $0x1e8] sm:$0xff]  ;;  %v315_v14 = vld [vmem:[#allocation7 + $0x200] sm:$0xff]  ;;  %v1081_v15 = vpack.c.bf16 %v308_v12, %v305_v11  ;;  %v314_v18 = vld [vmem:[#allocation7 + $0x1f8] sm:$0xff] }
  0x4b   :  { %v1083_v16 = vpack.c.bf16 %v315_v14, %v312_v13  ;;  %v311_v17 = vld [vmem:[#allocation7 + $0x1e0] sm:$0xff]  ;;  %v318_v19 = vld [vmem:[#allocation7 + $0x218] sm:$0xff]  ;;  %v321_v20 = vld [vmem:[#allocation7 + $0x230] sm:$0xff] }
  0x4c   :  { %1058 = vmatpush1.bf16.msra.mxu0 %v1057_v42  ;;  %v1085_v21 = vpack.c.bf16 %v314_v18, %v311_v17  ;;  %v1087_v22 = vpack.c.bf16 %v321_v20, %v318_v19  ;;  %v317_v23 = vld [vmem:[#allocation7 + $0x210] sm:$0xff]  ;;  %v320_v24 = vld [vmem:[#allocation7 + $0x228] sm:$0xff]  ;;  %v327_v26 = vld [vmem:[#allocation7 + $0x260] sm:$0xff] }
  0x4d   :  { %1060 = vmatprep.subr.bf16.mxu0 %v1059_v43  ;;  %v324_v25 = vld [vmem:[#allocation7 + $0x248] sm:$0xff]  ;;  %v1089_v27 = vpack.c.bf16 %v320_v24, %v317_v23  ;;  %v323_v29 = vld [vmem:[#allocation7 + $0x240] sm:$0xff]  ;;  %v326_v30 = vld [vmem:[#allocation7 + $0x258] sm:$0xff] }
  0x4e   :  { %v1091_v28 = vpack.c.bf16 %v327_v26, %v324_v25  ;;  %v330_v31 = vld [vmem:[#allocation7 + $0x278] sm:$0xff]  ;;  %v333_v32 = vld [vmem:[#allocation7 + $0x290] sm:$0xff]  ;;  %v1093_v33 = vpack.c.bf16 %v326_v30, %v323_v29  ;;  %v332_v36 = vld [vmem:[#allocation7 + $0x288] sm:$0xff] }
  0x4f   :  { %v1095_v34 = vpack.c.bf16 %v333_v32, %v330_v31  ;;  %v329_v35 = vld [vmem:[#allocation7 + $0x270] sm:$0xff]  ;;  %v336_v37 = vld [vmem:[#allocation7 + $0x2a8] sm:$0xff]  ;;  %v339_v38 = vld [vmem:[#allocation7 + $0x2c0] sm:$0xff] }
  0x50   :  { %1062 = vmatpush1.bf16.msra.mxu0 %v1061_v48  ;;  %v1097_v39 = vpack.c.bf16 %v332_v36, %v329_v35  ;;  %v1099_v40 = vpack.c.bf16 %v339_v38, %v336_v37  ;;  %v335_v41 = vld [vmem:[#allocation7 + $0x2a0] sm:$0xff]  ;;  %v338_v42 = vld [vmem:[#allocation7 + $0x2b8] sm:$0xff]  ;;  %v345_v45 = vld [vmem:[#allocation7 + $0x2f0] sm:$0xff] }
  0x51   :  { %1064 = vmatprep.subr.bf16.mxu0 %v1063_v49  ;;  %v1101_v43 = vpack.c.bf16 %v338_v42, %v335_v41  ;;  %v342_v44 = vld [vmem:[#allocation7 + $0x2d8] sm:$0xff]  ;;  %v341_v47 = vld [vmem:[#allocation7 + $0x2d0] sm:$0xff]  ;;  %v344_v48 = vld [vmem:[#allocation7 + $0x2e8] sm:$0xff]  ;;  %v81_v42 = vlaneseq }
  0x52   :  { %v1103_v46 = vpack.c.bf16 %v345_v45, %v342_v44  ;;  %v1105_v49 = vpack.c.bf16 %v344_v48, %v341_v47  ;;  %v348_v50 = vld [vmem:[#allocation7 + $0x308] sm:$0xff]  ;;  %v351_v51 = vld [vmem:[#allocation7 + $0x320] sm:$0xff]  ;;  %v301_v53 = vld [vmem:[#allocation7 + $0x190] sm:$0xff] }
  0x53   :  { %v1107_v52 = vpack.c.bf16 %v351_v51, %v348_v50  ;;  %v253_v57 = vld [vmem:[#allocation7 + $0x10] sm:$0xff]  ;;  %v256_v58 = vld [vmem:[#allocation7 + $0x28] sm:$0xff]  ;;  %v259_v0 = vld [vmem:[#allocation7 + $0x40] sm:$0xff] }
  0x54   :  { %1066 = vmatpush1.bf16.msra.mxu0 %v1065_v54  ;;  %v304_v54 = vld [vmem:[#allocation7 + $0x1a8] sm:$0xff]  ;;  %v1173_v62 = vpack.c.bf16 %v256_v58, %v253_v57  ;;  %v262_v2 = vld [vmem:[#allocation7 + $0x58] sm:$0xff]  ;;  %v265_v7 = vld [vmem:[#allocation7 + $0x70] sm:$0xff] }
  0x55   :  { %1068 = vmatprep.subr.bf16.mxu0 %v1067_v55  ;;  %v444_v55 = vld [vmem:[%s1481_s4 + $0x8] sm:$0xf]  ;;  %v1171_v56 = vpack.c.bf16 %v304_v54, %v301_v53  ;;  %v1177_v5 = vpack.c.bf16 %v262_v2, %v259_v0  ;;  %v274_v13 = vld [vmem:[#allocation7 + $0xb8] sm:$0xff]  ;;  %v325_v14 = vld [vmem:[#allocation7 + $0x250] sm:$0xff] }
  0x56   :  { %v268_v8 = vld [vmem:[#allocation7 + $0x88] sm:$0xff]  ;;  %v271_v12 = vld [vmem:[#allocation7 + $0xa0] sm:$0xff]  ;;  %v277_v18 = vld [vmem:[#allocation7 + $0xd0] sm:$0xff] }
  0x57   :  { %v1181_v11 = vpack.c.bf16 %v268_v8, %v265_v7  ;;  %v280_v19 = vld [vmem:[#allocation7 + $0xe8] sm:$0xff]  ;;  %v331_v20 = vld [vmem:[#allocation7 + $0x280] sm:$0xff]  ;;  %v286_v25 = vld [vmem:[#allocation7 + $0x118] sm:$0xff] }
  0x58   :  { %1070 = vmatpush1.bf16.msra.mxu0 %v1069_v60  ;;  %v307_v60 = vld [vmem:[#allocation7 + $0x1c0] sm:$0xff]  ;;  %v337_v26 = vld [vmem:[#allocation7 + $0x2b0] sm:$0xff]  ;;  %v292_v31 = vld [vmem:[#allocation7 + $0x148] sm:$0xff] }
  0x59   :  { %1072 = vmatprep.subr.bf16.mxu0 %v1071_v61  ;;  %v310_v61 = vld [vmem:[#allocation7 + $0x1d8] sm:$0xff]  ;;  %v283_v24 = vld [vmem:[#allocation7 + $0x100] sm:$0xff]  ;;  %v289_v30 = vld [vmem:[#allocation7 + $0x130] sm:$0xff] }
  0x5a   :  { %v1175_v63 = vpack.c.bf16 %v310_v61, %v307_v60  ;;  %v343_v32 = vld [vmem:[#allocation7 + $0x2e0] sm:$0xff]  ;;  %v298_v37 = vld [vmem:[#allocation7 + $0x178] sm:$0xff]  ;;  %v397_v38 = vld [vmem:[#allocation7 + $0x490] sm:$0xff] }
  0x5b   :  { %v295_v36 = vld [vmem:[#allocation7 + $0x160] sm:$0xff]  ;;  %v354_v57 = vld [vmem:[#allocation7 + $0x338] sm:$0xff] }
  0x5c   :  { %1074 = vmatpush1.bf16.msra.mxu0 %v1073_v3  ;;  %v313_v3 = vld [vmem:[#allocation7 + $0x1f0] sm:$0xff]  ;;  %v1440_v45 = vld [vmem:[%s1479_s2] sm:$0xf] }
  0x5d   :  { %1076 = vmatprep.subr.bf16.mxu0 %v1075_v4  ;;  %v316_v4 = vld [vmem:[#allocation7 + $0x208] sm:$0xff]  ;;  %v347_v51 = vld [vmem:[#allocation7 + $0x300] sm:$0xff]  ;;  %v406_v61 = vld [vmem:[#allocation7 + $0x4d8] sm:$0xff] }
  0x5e   :  { %v1179_v6 = vpack.c.bf16 %v316_v4, %v313_v3  ;;  %v403_v60 = vld [vmem:[#allocation7 + $0x4c0] sm:$0xff]  ;;  %v353_v3 = vld [vmem:[#allocation7 + $0x330] sm:$0xff]  ;;  %v356_v4 = vld [vmem:[#allocation7 + $0x348] sm:$0xff] }
  0x5f   :  { %v1207_v8 = vpack.c.bf16 %v406_v61, %v403_v60  ;;  %v380_v60 = vld [vmem:[#allocation7 + $0x408] sm:$0xff] }
  0x60   :  { %1078 = vmatpush1.bf16.msra.mxu0 %v1077_v9  ;;  %v319_v9 = vld [vmem:[#allocation7 + $0x220] sm:$0xff] }
  0x61   :  { %1080 = vmatprep.subr.bf16.mxu0 %v1079_v10  ;;  %v322_v10 = vld [vmem:[#allocation7 + $0x238] sm:$0xff] }
  0x64   :  { %1082 = vmatpush1.bf16.msra.mxu0 %v1081_v15  ;;  %v328_v15 = vld [vmem:[#allocation7 + $0x268] sm:$0xff] }
  0x65   :  { %1084 = vmatprep.subr.bf16.mxu0 %v1083_v16  ;;  %v1185_v16 = vpack.c.bf16 %v274_v13, %v271_v12  ;;  %v1187_v17 = vpack.c.bf16 %v328_v15, %v325_v14  ;;  %v363_v12 = vld [vmem:[#allocation7 + $0x380] sm:$0xff]  ;;  %v409_v13 = vld [vmem:[#allocation7 + $0x4f0] sm:$0xff]  ;;  %v412_v14 = vld [vmem:[#allocation7 + $0x508] sm:$0xff] }
  0x68   :  { %1086 = vmatpush1.bf16.msra.mxu0 %v1085_v21  ;;  %v334_v21 = vld [vmem:[#allocation7 + $0x298] sm:$0xff] }
  0x69   :  { %1088 = vmatprep.subr.bf16.mxu0 %v1087_v22  ;;  %v1189_v22 = vpack.c.bf16 %v280_v19, %v277_v18  ;;  %v1191_v23 = vpack.c.bf16 %v334_v21, %v331_v20  ;;  %v359_v18 = vld [vmem:[#allocation7 + $0x360] sm:$0xff]  ;;  %v362_v19 = vld [vmem:[#allocation7 + $0x378] sm:$0xff] }
  0x6c   :  { %1090 = vmatpush1.bf16.msra.mxu0 %v1089_v27  ;;  %v340_v27 = vld [vmem:[#allocation7 + $0x2c8] sm:$0xff] }
  0x6d   :  { %1092 = vmatprep.subr.bf16.mxu0 %v1091_v28  ;;  %v1193_v28 = vpack.c.bf16 %v286_v25, %v283_v24  ;;  %v1195_v29 = vpack.c.bf16 %v340_v27, %v337_v26  ;;  %v364_v24 = vld [vmem:[#allocation7 + $0x388] sm:$0xff]  ;;  %v366_v25 = vld [vmem:[#allocation7 + $0x398] sm:$0xff]  ;;  %v369_v26 = vld [vmem:[#allocation7 + $0x3b0] sm:$0xff] }
  0x6e   :  { %v415_v27 = vld [vmem:[#allocation7 + $0x520] sm:$0xff] }
  0x70   :  { %1094 = vmatpush1.bf16.msra.mxu0 %v1093_v33  ;;  %v346_v33 = vld [vmem:[#allocation7 + $0x2f8] sm:$0xff] }
  0x71   :  { %1096 = vmatprep.subr.bf16.mxu0 %v1095_v34  ;;  %v1197_v34 = vpack.c.bf16 %v292_v31, %v289_v30  ;;  %v1199_v35 = vpack.c.bf16 %v346_v33, %v343_v32  ;;  %v365_v31 = vld [vmem:[#allocation7 + $0x390] sm:$0xff]  ;;  %v368_v32 = vld [vmem:[#allocation7 + $0x3a8] sm:$0xff]  ;;  %v1119_v33 = vpack.c.bf16 %v369_v26, %v366_v25  ;;  %v391_v25 = vld [vmem:[#allocation7 + $0x460] sm:$0xff] }
  0x72   :  { %v394_v26 = vld [vmem:[#allocation7 + $0x478] sm:$0xff] }
  0x74   :  { %1098 = vmatpush1.bf16.msra.mxu0 %v1097_v39  ;;  %v400_v39 = vld [vmem:[#allocation7 + $0x4a8] sm:$0xff] }
  0x75   :  { %1100 = vmatprep.subr.bf16.mxu0 %v1099_v40  ;;  %v1201_v40 = vpack.c.bf16 %v298_v37, %v295_v36  ;;  %v1203_v41 = vpack.c.bf16 %v400_v39, %v397_v38  ;;  %v370_v36 = vld [vmem:[#allocation7 + $0x3b8] sm:$0xff]  ;;  %v372_v37 = vld [vmem:[#allocation7 + $0x3c8] sm:$0xff]  ;;  %v375_v38 = vld [vmem:[#allocation7 + $0x3e0] sm:$0xff] }
  0x76   :  { %v421_v39 = vld [vmem:[#allocation7 + $0x550] sm:$0xff] }
  0x78   :  { %1102 = vmatpush1.bf16.msra.mxu0 %v1101_v43  ;;  %v1432_v43 = vshrl.u32 %v81_v42, 7 }
  0x79   :  { %1104 = vmatprep.subr.bf16.mxu0 %v1103_v46 }
  0x7a   :  { %v1435_v44 = vsub.s32 0, %v1432_v43  ;;  %v1443_v46 = vsub.s32 1, %v1432_v43 }
  0x7c   :  { %1106 = vmatpush1.bf16.msra.mxu0 %v1105_v49  ;;  %v84_v47 = vrot.slane %v1440_v45, %v1435_v44  ;;  %v88_v48 = vrot.slane %v1440_v45, %v1443_v46  ;;  %v95_v49 = vsub.s32 3, %v1432_v43 }
  0x7d   :  { %1108 = vmatprep.subr.bf16.mxu0 %v1107_v52  ;;  %v350_v52 = vld [vmem:[#allocation7 + $0x318] sm:$0xff] }
  0x7e   :  { %v1109_v0 = vpack.c.bf16 %v350_v52, %v347_v51  ;;  %v373_v51 = vld [vmem:[#allocation7 + $0x3d0] sm:$0xff]  ;;  %v376_v52 = vld [vmem:[#allocation7 + $0x3e8] sm:$0xff] }
  0xad   :  { %v446_v59 = vpop.permute.xlu0 %445 }
  0xae   :  { %954 = vmatmul.mubr.msk.f32.vlgmr.msra.gmra.mrb[4].mxu1 %vm450_vm2, %v446_v59 }
  0xaf   :  { %1031 = vmatpush3.msk.msra.mxu1 %vm453_vm1, %v444_v55  ;;  %1032 = vmatprep.mubr.msk.f32.mxu1 %vm1329_vm3, %v1327_v1  ;;  %v1183_v1 = vpack.c.bf16 %v322_v10, %v319_v9  ;;  %v349_v55 = vld [vmem:[#allocation7 + $0x310] sm:$0xff]  ;;  %v355_v9 = vld [vmem:[#allocation7 + $0x340] sm:$0xff]  ;;  %v358_v10 = vld [vmem:[#allocation7 + $0x358] sm:$0xff] }
  0xb0   :  { %1172 = vmatprep.subr.bf16.mxu1 %v1171_v56  ;;  %v352_v56 = vld [vmem:[#allocation7 + $0x328] sm:$0xff] }
  0xb1   :  { %v1205_v2 = vpack.c.bf16 %v352_v56, %v349_v55  ;;  %v427_v55 = vld [vmem:[#allocation7 + $0x580] sm:$0xff]  ;;  %v430_v56 = vld [vmem:[#allocation7 + $0x598] sm:$0xff] }
  0xb2   :  { %1033 = vmatmul.mubr.msk.f32.vlgmr.msra.gmra.mrb[6].mxu1 %vm450_vm2, %v446_v59  ;;  %v357_v59 = vld [vmem:[#allocation7 + $0x350] sm:$0xff] }
  0xb3   :  { %1174 = vmatpush3.bf16.msra.mxu1 %v1173_v62  ;;  %v96_v62 = vrot.slane %v1440_v45, %v95_v49  ;;  %v1111_v7 = vpack.c.bf16 %v357_v59, %v354_v57  ;;  %v1123_v49 = vpack.c.bf16 %v375_v38, %v372_v37  ;;  %v377_v59 = vld [vmem:[#allocation7 + $0x3f0] sm:$0xff] }
  0xb4   :  { %1176 = vmatprep.subr.bf16.mxu1 %v1175_v63 }
  0xb7   :  { %1178 = vmatpush3.bf16.msra.mxu1 %v1177_v5 }
  0xb8   :  { %1180 = vmatprep.subr.bf16.mxu1 %v1179_v6 }
  0xbb   :  { %1182 = vmatpush3.bf16.msra.mxu1 %v1181_v11  ;;  %v360_v11 = vld [vmem:[#allocation7 + $0x368] sm:$0xff] }
  0xbc   :  { %1184 = vmatprep.subr.bf16.mxu1 %v1183_v1  ;;  %v1115_v21 = vpack.c.bf16 %v363_v12, %v360_v11  ;;  %v386_v11 = vld [vmem:[#allocation7 + $0x438] sm:$0xff] }
  0xbf   :  { %1186 = vmatpush3.bf16.msra.mxu1 %v1185_v16  ;;  %v1113_v16 = vpack.c.bf16 %v356_v4, %v353_v3  ;;  %v387_v3 = vld [vmem:[#allocation7 + $0x440] sm:$0xff]  ;;  %v433_v4 = vld [vmem:[#allocation7 + $0x5b0] sm:$0xff] }
  0xc0   :  { %1188 = vmatprep.subr.bf16.mxu1 %v1187_v17  ;;  %v1209_v17 = vpack.c.bf16 %v358_v10, %v355_v9  ;;  %v383_v10 = vld [vmem:[#allocation7 + $0x420] sm:$0xff] }
  0xc3   :  { %1190 = vmatpush3.bf16.msra.mxu1 %v1189_v22  ;;  %v1211_v22 = vpack.c.bf16 %v412_v14, %v409_v13  ;;  %v385_v13 = vld [vmem:[#allocation7 + $0x430] sm:$0xff]  ;;  %v388_v14 = vld [vmem:[#allocation7 + $0x448] sm:$0xff] }
  0xc4   :  { %1192 = vmatprep.subr.bf16.mxu1 %v1191_v23  ;;  %v361_v23 = vld [vmem:[#allocation7 + $0x370] sm:$0xff] }
  0xc5   :  { %v1213_v30 = vpack.c.bf16 %v364_v24, %v361_v23  ;;  %v392_v24 = vld [vmem:[#allocation7 + $0x468] sm:$0xff] }
  0xc7   :  { %1194 = vmatpush3.bf16.msra.mxu1 %v1193_v28  ;;  %v418_v28 = vld [vmem:[#allocation7 + $0x538] sm:$0xff] }
  0xc8   :  { %1196 = vmatprep.subr.bf16.mxu1 %v1195_v29  ;;  %v1117_v29 = vpack.c.bf16 %v362_v19, %v359_v18  ;;  %v442_v18 = vld [vmem:[#allocation7 + $0x5f8] sm:$0xff]  ;;  %v1133_v19 = vpack.c.bf16 %v386_v11, %v383_v10  ;;  %v431_v11 = vld [vmem:[#allocation7 + $0x5a0] sm:$0xff] }
  0xcb   :  { %1198 = vmatpush3.bf16.msra.mxu1 %v1197_v34  ;;  %v1215_v34 = vpack.c.bf16 %v418_v28, %v415_v27  ;;  %v396_v27 = vld [vmem:[#allocation7 + $0x488] sm:$0xff]  ;;  %v399_v28 = vld [vmem:[#allocation7 + $0x4a0] sm:$0xff] }
  0xcc   :  { %1200 = vmatprep.subr.bf16.mxu1 %v1199_v35  ;;  %v367_v35 = vld [vmem:[#allocation7 + $0x3a0] sm:$0xff] }
  0xcd   :  { %v1217_v42 = vpack.c.bf16 %v370_v36, %v367_v35  ;;  %v405_v35 = vld [vmem:[#allocation7 + $0x4d0] sm:$0xff] }
  0xcf   :  { %1202 = vmatpush3.bf16.msra.mxu1 %v1201_v40  ;;  %v424_v40 = vld [vmem:[#allocation7 + $0x568] sm:$0xff] }
  0xd0   :  { %1204 = vmatprep.subr.bf16.mxu1 %v1203_v41  ;;  %v1121_v41 = vpack.c.bf16 %v368_v32, %v365_v31  ;;  %v1139_v31 = vpack.c.bf16 %v399_v28, %v396_v27  ;;  %v395_v32 = vld [vmem:[#allocation7 + $0x480] sm:$0xff] }
 0x114   :  { %v171_v50 = vpop.f32.mrb[0].mxu1 }
 0x115   :  { %v172_v53 = vadd.f32 %v171_v50, %v84_v47  ;;  %v173_v54 = vpop.f32.mrb[1].mxu1  ;;  %v371_v47 = vld [vmem:[#allocation7 + $0x3c0] sm:$0xff]  ;;  %v1219_v50 = vpack.c.bf16 %v424_v40, %v421_v39  ;;  %v404_v39 = vld [vmem:[#allocation7 + $0x4c8] sm:$0xff] }
 0x116   :  { %v174_v58 = vadd.f32 %v173_v54, %v88_v48  ;;  %v374_v48 = vld [vmem:[#allocation7 + $0x3d8] sm:$0xff]  ;;  %v381_v54 = vld [vmem:[#allocation7 + $0x410] sm:$0xff]  ;;  %v408_v40 = vld [vmem:[#allocation7 + $0x4e8] sm:$0xff] }
 0x117   :  { %v247_v6 = vmax.f32 %v172_v53, 0.0  ;;  %v378_v53 = vld [vmem:[#allocation7 + $0x3f8] sm:$0xff]  ;;  %v1125_v57 = vpack.c.bf16 %v374_v48, %v371_v47  ;;  %v407_v48 = vld [vmem:[#allocation7 + $0x4e0] sm:$0xff] }
 0x118   :  { %v248_v63 = vmax.f32 %v174_v58, 0.0  ;;  %v1451_v5 = vpop.f32.mrb[2].mxu1  ;;  %v1221_v58 = vpack.c.bf16 %v376_v52, %v373_v51  ;;  %v1127_v61 = vpack.c.bf16 %v381_v54, %v378_v53  ;;  %v417_v51 = vld [vmem:[#allocation7 + $0x530] sm:$0xff] }
 0x119   :  { %v244_v1 = vpop.f32.mrb[3].mxu1  ;;  %v413_v54 = vld [vmem:[#allocation7 + $0x510] sm:$0xff] }
 0x11a   :  { %665 = vmatprep.mubr.f32.mxu0 %v248_v63  ;;  %807 = vmatprep.mubr.f32.mxu1 %v248_v63  ;;  %v245_v15 = vadd.f32 %v244_v1, %v96_v62  ;;  %v1223_v62 = vpack.c.bf16 %v430_v56, %v427_v55  ;;  %v379_v63 = vld [vmem:[#allocation7 + $0x400] sm:$0xff]  ;;  %v416_v55 = vld [vmem:[#allocation7 + $0x528] sm:$0xff] }
 0x11b   :  { %666 = vmatmul.mubr.f32.vlgmr.msra.gmra.mrb[0].mxu0 %v247_v6  ;;  %808 = vmatmul.mubr.f32.vlgmr.msra.gmra.mrb[8].mxu1 %v247_v6  ;;  %v436_v6 = vld [vmem:[#allocation7 + $0x5c8] sm:$0xff] }
 0x11c   :  { %1110 = vmatpush1.bf16.msra.mxu0 %v1109_v0  ;;  %1206 = vmatpush3.bf16.msra.mxu1 %v1205_v2  ;;  %v250_v20 = vmax.f32 %v245_v15, 0.0  ;;  %v382_v0 = vld [vmem:[#allocation7 + $0x418] sm:$0xff]  ;;  %v384_v2 = vld [vmem:[#allocation7 + $0x428] sm:$0xff]  ;;  %v1227_v12 = vpack.c.bf16 %v436_v6, %v433_v4 }
 0x11d   :  { %1112 = vmatprep.subr.bf16.mxu0 %v1111_v7  ;;  %1208 = vmatprep.subr.bf16.mxu1 %v1207_v8  ;;  %v1454_v7 = vsub.s32 2, %v1432_v43  ;;  %v1129_v8 = vpack.c.bf16 %v380_v60, %v377_v59  ;;  %v1225_v9 = vpack.c.bf16 %v382_v0, %v379_v63  ;;  %v1131_v1 = vpack.c.bf16 %v387_v3, %v384_v2  ;;  %v390_v15 = vld [vmem:[#allocation7 + $0x458] sm:$0xff]  ;;  %v420_v56 = vld [vmem:[#allocation7 + $0x548] sm:$0xff]  ;;  %v419_v60 = vld [vmem:[#allocation7 + $0x540] sm:$0xff] }
 0x11e   :  { %877 = vmatprep.mubr.f32.mxu1 %v250_v20  ;;  %736 = vmatprep.mubr.f32.mxu0 %v250_v20  ;;  %v1229_v20 = vpack.c.bf16 %v388_v14, %v385_v13  ;;  %v429_v63 = vld [vmem:[#allocation7 + $0x590] sm:$0xff]  ;;  %v428_v4 = vld [vmem:[#allocation7 + $0x588] sm:$0xff] }
 0x11f   :  { %v92_v43 = vrot.slane %v1440_v45, %v1454_v7  ;;  %v425_v3 = vld [vmem:[#allocation7 + $0x570] sm:$0xff]  ;;  %v432_v6 = vld [vmem:[#allocation7 + $0x5a8] sm:$0xff] }
 0x120   :  { %1114 = vmatpush1.bf16.msra.mxu0 %v1113_v16  ;;  %1210 = vmatpush3.bf16.msra.mxu1 %v1209_v17  ;;  %v393_v16 = vld [vmem:[#allocation7 + $0x470] sm:$0xff]  ;;  %v439_v17 = vld [vmem:[#allocation7 + $0x5e0] sm:$0xff] }
 0x121   :  { %1116 = vmatprep.subr.bf16.mxu0 %v1115_v21  ;;  %1212 = vmatprep.subr.bf16.mxu1 %v1211_v22  ;;  %v389_v21 = vld [vmem:[#allocation7 + $0x450] sm:$0xff]  ;;  %v1135_v22 = vpack.c.bf16 %v393_v16, %v390_v15  ;;  %v1231_v23 = vpack.c.bf16 %v442_v18, %v439_v17  ;;  %v440_v17 = vld [vmem:[#allocation7 + $0x5e8] sm:$0xff] }
 0x122   :  { %v1137_v45 = vpack.c.bf16 %v392_v24, %v389_v21  ;;  %v441_v13 = vld [vmem:[#allocation7 + $0x5f0] sm:$0xff] }
 0x123   :  { %v437_v16 = vld [vmem:[#allocation7 + $0x5d0] sm:$0xff] }
 0x124   :  { %1118 = vmatpush1.bf16.msra.mxu0 %v1117_v29  ;;  %1214 = vmatpush3.bf16.msra.mxu1 %v1213_v30  ;;  %v1459_v29 = vadd.f32 %v1451_v5, %v92_v43  ;;  %v1233_v30 = vpack.c.bf16 %v394_v26, %v391_v25  ;;  %v401_v5 = vld [vmem:[#allocation7 + $0x4b0] sm:$0xff]  ;;  %v1169_v18 = vpack.c.bf16 %v440_v17, %v437_v16 }
 0x125   :  { %1120 = vmatprep.subr.bf16.mxu0 %v1119_v33  ;;  %1216 = vmatprep.subr.bf16.mxu1 %v1215_v34  ;;  %v398_v33 = vld [vmem:[#allocation7 + $0x498] sm:$0xff] }
 0x126   :  { %v402_v34 = vld [vmem:[#allocation7 + $0x4b8] sm:$0xff]  ;;  %v249_v36 = vmax.f32 %v1459_v29, 0.0  ;;  %v1141_v37 = vpack.c.bf16 %v398_v33, %v395_v32 }
 0x127   :  { %v1143_v38 = vpack.c.bf16 %v405_v35, %v402_v34 }
 0x128   :  { %1122 = vmatpush1.bf16.msra.mxu0 %v1121_v41  ;;  %1218 = vmatpush3.bf16.msra.mxu1 %v1217_v42  ;;  %v411_v41 = vld [vmem:[#allocation7 + $0x500] sm:$0xff]  ;;  %v1145_v42 = vpack.c.bf16 %v404_v39, %v401_v5 }
 0x129   :  { %1124 = vmatprep.subr.bf16.mxu0 %v1123_v49  ;;  %1220 = vmatprep.subr.bf16.mxu1 %v1219_v50  ;;  %v1147_v47 = vpack.c.bf16 %v411_v41, %v408_v40  ;;  %v410_v49 = vld [vmem:[#allocation7 + $0x4f8] sm:$0xff] }
 0x12a   :  { %v414_v50 = vld [vmem:[#allocation7 + $0x518] sm:$0xff]  ;;  %v1149_v52 = vpack.c.bf16 %v410_v49, %v407_v48 }
 0x12b   :  { %v1151_v53 = vpack.c.bf16 %v417_v51, %v414_v50 }
 0x12c   :  { %1126 = vmatpush1.bf16.msra.mxu0 %v1125_v57  ;;  %1222 = vmatpush3.bf16.msra.mxu1 %v1221_v58  ;;  %v423_v57 = vld [vmem:[#allocation7 + $0x560] sm:$0xff]  ;;  %v1153_v58 = vpack.c.bf16 %v416_v55, %v413_v54 }
 0x12d   :  { %1128 = vmatprep.subr.bf16.mxu0 %v1127_v61  ;;  %1224 = vmatprep.subr.bf16.mxu1 %v1223_v62  ;;  %v1155_v59 = vpack.c.bf16 %v423_v57, %v420_v56  ;;  %v422_v61 = vld [vmem:[#allocation7 + $0x558] sm:$0xff] }
 0x12e   :  { %v426_v62 = vld [vmem:[#allocation7 + $0x578] sm:$0xff]  ;;  %v1157_v0 = vpack.c.bf16 %v422_v61, %v419_v60 }
 0x12f   :  { %v1159_v2 = vpack.c.bf16 %v429_v63, %v426_v62 }
 0x130   :  { %1130 = vmatpush1.bf16.msra.mxu0 %v1129_v8  ;;  %1226 = vmatpush3.bf16.msra.mxu1 %v1225_v9  ;;  %v435_v8 = vld [vmem:[#allocation7 + $0x5c0] sm:$0xff]  ;;  %v1161_v9 = vpack.c.bf16 %v428_v4, %v425_v3 }
 0x131   :  { %1132 = vmatprep.subr.bf16.mxu0 %v1131_v1  ;;  %1228 = vmatprep.subr.bf16.mxu1 %v1227_v12  ;;  %v1163_v10 = vpack.c.bf16 %v435_v8, %v432_v6  ;;  %v434_v1 = vld [vmem:[#allocation7 + $0x5b8] sm:$0xff] }
 0x132   :  { %v438_v12 = vld [vmem:[#allocation7 + $0x5d8] sm:$0xff]  ;;  %v1165_v14 = vpack.c.bf16 %v434_v1, %v431_v11 }
 0x133   :  { %v1167_v15 = vpack.c.bf16 %v441_v13, %v438_v12 }
 0x134   :  { %1134 = vmatpush1.bf16.msra.mxu0 %v1133_v19  ;;  %1230 = vmatpush3.bf16.msra.mxu1 %v1229_v20 }
 0x135   :  { %1136 = vmatprep.subr.bf16.mxu0 %v1135_v22  ;;  %1232 = vmatprep.subr.bf16.mxu1 %v1231_v23 }
 0x138   :  { %1138 = vmatpush1.bf16.msra.mxu0 %v1137_v45  ;;  %1234 = vmatpush3.bf16.msra.mxu1 %v1233_v30  ;;  %v883_v45 = vld [vmem:[%s1482_s5] sm:$0x7] }
 0x139   :  { %1140 = vmatprep.subr.bf16.mxu0 %v1139_v31  ;;  %v896_v30 = vrot.slane %v883_v45, %v1454_v7  ;;  %v888_v31 = vrot.slane %v883_v45, %v1435_v44  ;;  %v892_v34 = vrot.slane %v883_v45, %v1443_v46 }
 0x13b   :  { %878 = vmatmul.mubr.f32.vlgmr.msra.gmra.mrb[10].mxu1 %v249_v36 }
 0x13c   :  { %1142 = vmatpush1.bf16.msra.mxu0 %v1141_v37 }
 0x13d   :  { %1144 = vmatprep.subr.bf16.mxu0 %v1143_v38 }
 0x140   :  { %1146 = vmatpush1.bf16.msra.mxu0 %v1145_v42 }
 0x141   :  { %1148 = vmatprep.subr.bf16.mxu0 %v1147_v47 }
 0x144   :  { %1150 = vmatpush1.bf16.msra.mxu0 %v1149_v52 }
 0x145   :  { %1152 = vmatprep.subr.bf16.mxu0 %v1151_v53 }
 0x148   :  { %1154 = vmatpush1.bf16.msra.mxu0 %v1153_v58  ;;  %v957_v58 = vld [vmem:[#allocation2] ss:$0 sm:$0xff] }
 0x149   :  { %1156 = vmatprep.subr.bf16.mxu0 %v1155_v59 }
 0x14c   :  { %1158 = vmatpush1.bf16.msra.mxu0 %v1157_v0 }
 0x14d   :  { %1160 = vmatprep.subr.bf16.mxu0 %v1159_v2 }
 0x150   :  { %1162 = vmatpush1.bf16.msra.mxu0 %v1161_v9 }
 0x151   :  { %1164 = vmatprep.subr.bf16.mxu0 %v1163_v10 }
 0x154   :  { %1166 = vmatpush1.bf16.msra.mxu0 %v1165_v14 }
 0x155   :  { %1168 = vmatprep.subr.bf16.mxu0 %v1167_v15 }
 0x158   :  { %1170 = vmatpush1.bf16.msra.mxu0 %v1169_v18 }
 0x15b   :  { %737 = vmatmul.mubr.f32.vlgmr.msra.gmra.mrb[0].mxu0 %v249_v36  ;;  %v906_v36 = vld [vmem:[%s1483_s6] sm:$0x7] }
 0x15c   :  { %v911_v39 = vrot.slane %v906_v36, %v1435_v44  ;;  %v915_v42 = vrot.slane %v906_v36, %v1443_v46  ;;  %v919_v47 = vrot.slane %v906_v36, %v1454_v7 }
 0x181   :  { %v526_v43 = vpop.f32.mrb[4].mxu1 }
 0x182   :  { %v528_v19 = vpop.f32.mrb[5].mxu1 }
 0x185   :  { %v597_v20 = vpop.f32.mrb[6].mxu1 }
 0x186   :  { %v1034_v21 = vpop.f32.mrb[7].mxu1 }
 0x1ee   :  { %v992_v22 = vpop.f32.mrb[8].mxu1 }
 0x1ef   :  { %v993_v23 = vpop.f32.mrb[9].mxu1 }
 0x1f0   :  { %v994_v24 = vadd.f32 %v993_v23, %v992_v22 }
 0x1f2   :  { %v810_v25 = vadd.f32 %v994_v24, %v597_v20 }
 0x20e   :  { %v1027_v26 = vpop.f32.mrb[10].mxu1 }
 0x20f   :  { %v1028_v27 = vpop.f32.mrb[11].mxu1 }
 0x210   :  { %v1029_v28 = vadd.f32 %v1028_v27, %v1027_v26 }
 0x212   :  { %v880_v29 = vadd.f32 %v1029_v28, %v810_v25 }
 0x214   :  { %v902_v32 = vadd.f32 %v896_v30, %v880_v29 }
 0x216   :  { %v905_v40 = vmax.f32 %v902_v32, 0.0 }
 0x218   :  { %v925_v52 = vmul.f32 %v919_v47, %v905_v40 }
 0x21a   :  { %v930_v56 = vsel %vm926_vm4, %v925_v52, 0.0 }
 0x22e   :  { %v738_v33 = vpop.f32.mrb[0].mxu0 }
 0x22f   :  { %v1235_v35 = vadd.f32 %v738_v33, %v526_v43  ;;  %v740_v37 = vpop.f32.mrb[1].mxu0 }
 0x230   :  { %v1236_v38 = vadd.f32 %v740_v37, %v528_v19 }
 0x231   :  { %v900_v5 = vadd.f32 %v1235_v35, %v888_v31 }
 0x232   :  { %v901_v41 = vadd.f32 %v1236_v38, %v892_v34 }
 0x233   :  { %v903_v48 = vmax.f32 %v900_v5, 0.0 }
 0x234   :  { %v904_v49 = vmax.f32 %v901_v41, 0.0 }
 0x235   :  { %v923_v50 = vmul.f32 %v911_v39, %v903_v48 }
 0x236   :  { %v924_v51 = vmul.f32 %v915_v42, %v904_v49 }
 0x237   :  { %v927_v53 = vsel %vm926_vm4, %v923_v50, 0.0 }
 0x238   :  { %v928_v54 = vsel %vm926_vm4, %v924_v51, 0.0 }
 0x239   :  { %v929_v55 = vadd.f32 %v928_v54, %v927_v53 }
 0x23b   :  { %v931_v57 = vadd.f32 %v930_v56, %v929_v55 }
 0x23d   :  { %932 = vadd.xlane.f32.xlu0 %v931_v57 }
 0x2ca   :  { %v933_v44 = vpop.xlane.xlu0 %932 }
 0x2cb   :  { %v941_v59 = vadd.f32 %v957_v58, %v933_v44 }
 0x2cd   :  { %943 = vst.msk [vmem:[%s1485_s8] sm:$0x3] %vm942_vm5, %v941_v59 }
 0x2ce   :  { %948 = vsyncpa [#allocation4], 1 }
 0x2cf   :  { %949 = vsyncpa [#allocation6], 1 }

</bundles_post_ra>
